<compile_context>
chip_gen: v5e
topology: v5e:2x2
jax: 0.10.0
libtpu: 0.0.40
codegen_flags: <defaults>
</compile_context>

<pallas_src>
import functools

import jax
import jax.numpy as jnp
from jax import lax
from jax.experimental import pallas as pl
from jax.experimental.pallas import tpu as pltpu


def eoe_kernel(x_ref, wab_t_ref, bab_t_ref, wc_t_ref, bc_t_ref, o_ref):
    # x_ref: (tile_b, D_IN).  Contract the feature axis of both operands so the
    # result keeps the batch dim on lanes (h^T = W_ab^T @ x^T), i.e. A @ B^T.
    h = lax.dot_general(
        wab_t_ref[...], x_ref[...],
        dimension_numbers=(((1,), (1,)), ((), ())),
        preferred_element_type=jnp.float32,
    )  # (8, tile_b)
    h = jnp.maximum(h + bab_t_ref[...], 0.0)  # relu(cat(out1, out2))^T
    y = lax.dot_general(
        wc_t_ref[...], h,
        dimension_numbers=(((1,), (0,)), ((), ())),
        preferred_element_type=jnp.float32,
    )  # (4, tile_b)
    o_ref[...] = (y + bc_t_ref[...]).astype(o_ref.dtype)


def prepare_params(wa, ba, wb, bb, wc, bc):
    """One-time parameter preparation (call OUTSIDE the hot path).

    Folds the x*0.5 scale into the head weights, fuses the two heads into a
    single weight, and pre-transposes everything for the batch-on-lanes kernel.
    Inputs use (in_features, out_features) layout (transpose of torch Linear.weight).
    """
    w_ab_t = 0.5 * jnp.concatenate([wa, wb], axis=1).T   # (8, D_IN)
    b_ab_t = jnp.concatenate([ba, bb])[:, None]          # (8, 1)
    wc_t = wc.T                                          # (4, 8)
    bc_t = bc[:, None]                                   # (4, 1)
    return w_ab_t, b_ab_t, wc_t, bc_t


@functools.partial(jax.jit, static_argnames=("tile_b",))
def eoe_forward(x, w_ab_t, b_ab_t, wc_t, bc_t, *, tile_b=16384):
    """x: (B, D_IN) f32.  Params from prepare_params.  Returns (B, 4) f32."""
    B, D = x.shape
    n_hid = w_ab_t.shape[0]
    n_out = wc_t.shape[0]

    # Tile selection: single full block for small B, otherwise a multiple of
    # 128 rows so the lane-dense output block satisfies the (8,128) rule; the
    # ragged last block is handled by Pallas's masked boundary store (no pad).
    if B <= tile_b:
        tb = B
    else:
        tb = max((tile_b // 128) * 128, 128)
    grid = (pl.cdiv(B, tb),)

    # Scoped VMEM: double-buffered x block (16-wide minor dim lane-pads to 128
    # -> tb*512 B each) + double-buffered output block (+ headroom).
    vmem_bytes = int(min(2 * tb * 128 * 4 + 2 * tb * 8 * 4 + (4 << 20),
                         100 * 1024 * 1024))

    flops = 2 * B * (D * n_hid + n_hid * n_out)
    bytes_accessed = 4 * (B * D + B * n_out
                          + w_ab_t.size + b_ab_t.size + wc_t.size + bc_t.size)

    y_t = pl.pallas_call(
        eoe_kernel,
        out_shape=jax.ShapeDtypeStruct((n_out, B), jnp.float32),
        grid=grid,
        in_specs=[
            # Streamed activations: one (tb, D) block per grid step.
            pl.BlockSpec((tb, D), lambda i: (i, 0)),
            # Weights / biases: constant index_map -> VMEM-resident, no re-DMA.
            pl.BlockSpec(w_ab_t.shape, lambda i: (0, 0)),
            pl.BlockSpec(b_ab_t.shape, lambda i: (0, 0)),
            pl.BlockSpec(wc_t.shape, lambda i: (0, 0)),
            pl.BlockSpec(bc_t.shape, lambda i: (0, 0)),
        ],
        # Lane-dense output blocks: batch on the 128-lane axis.
        out_specs=pl.BlockSpec((n_out, tb), lambda i: (0, i)),
        compiler_params=pltpu.CompilerParams(
            dimension_semantics=("parallel",),
            vmem_limit_bytes=vmem_bytes,
        ),
        cost_estimate=pl.CostEstimate(
            flops=int(flops),
            transcendentals=0,
            bytes_accessed=int(bytes_accessed),
        ),
    )(x, w_ab_t, b_ab_t, wc_t, bc_t)

    # Restore the PyTorch (B, 4) layout.  This tiny transpose is the only extra
    # HBM traffic; consumers that accept (4, B) directly should use y_t as-is.
    return y_t.T


def eoe_reference(x, wa, ba, wb, bb, wc, bc):
    out1 = (x * 0.5) @ wa + ba
    out2 = (x * 0.5) @ wb + bb
    h = jnp.maximum(jnp.concatenate([out1, out2], axis=1), 0.0)
    return h @ wc + bc


if __name__ == "__main__":
    D_IN = 16

    key = jax.random.PRNGKey(0)
    kx, ka, kab, kb, kbb, kc, kcb, kx2 = jax.random.split(key, 8)

    wa = jax.random.normal(ka,  (D_IN, 4), dtype=jnp.float32) * 0.1
    ba = jax.random.normal(kab, (4,),      dtype=jnp.float32) * 0.1
    wb = jax.random.normal(kb,  (D_IN, 4), dtype=jnp.float32) * 0.1
    bb = jax.random.normal(kbb, (4,),      dtype=jnp.float32) * 0.1
    wc = jax.random.normal(kc,  (8, 4),    dtype=jnp.float32) * 0.1
    bc = jax.random.normal(kcb, (4,),      dtype=jnp.float32) * 0.1

    # One-time parameter prep (outside the hot path).
    w_ab_t, b_ab_t, wc_t, bc_t = prepare_params(wa, ba, wb, bb, wc, bc)

    # Small-batch check (single grid step, blocks equal full dims).
    B = 16
    x = jax.random.normal(kx, (B, D_IN), dtype=jnp.float32)
    y = jax.block_until_ready(eoe_forward(x, w_ab_t, b_ab_t, wc_t, bc_t))
    y_ref = eoe_reference(x, wa, ba, wb, bb, wc, bc)
    assert y.shape == (B, 4)
    assert jnp.allclose(y, y_ref, atol=1e-5, rtol=1e-5)

    # Multi-tile check with a ragged last block (grid=3, last block masked):
    # exercises the no-pad cdiv grid and the lane-dense boundary store.
    B2 = 300
    x2 = jax.random.normal(kx2, (B2, D_IN), dtype=jnp.float32)
    y2 = jax.block_until_ready(
        eoe_forward(x2, w_ab_t, b_ab_t, wc_t, bc_t, tile_b=128))
    y2_ref = eoe_reference(x2, wa, ba, wb, bb, wc, bc)
    assert y2.shape == (B2, 4)
    assert jnp.allclose(y2, y2_ref, atol=1e-5, rtol=1e-5)

    print("KERNEL_OK")
</pallas_src>

<mosaic_0001>
module attributes {stable_mosaic.version = 11 : i64} {
  func.func @eoe_kernel(%arg0: i32, %arg1: memref<16x16xf32, #tpu.memory_space<vmem>>, %arg2: memref<8x16xf32, #tpu.memory_space<vmem>>, %arg3: memref<8x1xf32, #tpu.memory_space<vmem>>, %arg4: memref<4x8xf32, #tpu.memory_space<vmem>>, %arg5: memref<4x1xf32, #tpu.memory_space<vmem>>, %arg6: memref<4x16xf32, #tpu.memory_space<vmem>>) attributes {dimension_semantics = [#tpu.dimension_semantics<parallel>], iteration_bounds = array<i64: 1>, scalar_prefetch = 0 : i64, scratch_operands = 0 : i64, tpu.core_type = #tpu.core_type<tc>, window_params = [{transform_indices = @transform_0, window_bounds = array<i64: 16, 16>}, {pipeline_mode = #tpu.pipeline_mode<synchronous>, transform_indices = @transform_1, window_bounds = array<i64: 8, 16>}, {pipeline_mode = #tpu.pipeline_mode<synchronous>, transform_indices = @transform_2, window_bounds = array<i64: 8, 1>}, {pipeline_mode = #tpu.pipeline_mode<synchronous>, transform_indices = @transform_3, window_bounds = array<i64: 4, 8>}, {pipeline_mode = #tpu.pipeline_mode<synchronous>, transform_indices = @transform_4, window_bounds = array<i64: 4, 1>}, {transform_indices = @transform_5, window_bounds = array<i64: 4, 16>}]} {
    %c0 = arith.constant 0 : index
    %c0_0 = arith.constant 0 : index
    %0 = vector.load %arg2[%c0, %c0_0] : memref<8x16xf32, #tpu.memory_space<vmem>>, vector<8x16xf32>
    %c0_1 = arith.constant 0 : index
    %c0_2 = arith.constant 0 : index
    %1 = vector.load %arg1[%c0_1, %c0_2] : memref<16x16xf32, #tpu.memory_space<vmem>>, vector<16x16xf32>
    %cst = arith.constant dense<0.000000e+00> : vector<8x16xf32>
    %2 = tpu.matmul %0, %1, %cst {dimension_numbers = #tpu.dot_dimension_numbers<[1], [1], [0], [0], [0, 0, 1, 0], [], []>} : vector<8x16xf32>, vector<16x16xf32>, vector<8x16xf32> -> vector<8x16xf32>
    %c0_3 = arith.constant 0 : index
    %c0_4 = arith.constant 0 : index
    %3 = vector.load %arg3[%c0_3, %c0_4] : memref<8x1xf32, #tpu.memory_space<vmem>>, vector<8x1xf32>
    %4 = vector.broadcast %3 : vector<8x1xf32> to vector<8x16xf32>
    %5 = arith.addf %2, %4 : vector<8x16xf32>
    %cst_5 = arith.constant 0.000000e+00 : f32
    %6 = vector.broadcast %cst_5 : f32 to vector<8x16xf32>
    %7 = arith.maximumf %5, %6 : vector<8x16xf32>
    %c0_6 = arith.constant 0 : index
    %c0_7 = arith.constant 0 : index
    %8 = vector.load %arg4[%c0_6, %c0_7] : memref<4x8xf32, #tpu.memory_space<vmem>>, vector<4x8xf32>
    %cst_8 = arith.constant dense<0.000000e+00> : vector<4x16xf32>
    %9 = tpu.matmul %8, %7, %cst_8 {dimension_numbers = #tpu.dot_dimension_numbers<[1], [0], [0], [1], [0, 0, 1, 1], [], []>} : vector<4x8xf32>, vector<8x16xf32>, vector<4x16xf32> -> vector<4x16xf32>
    %c0_9 = arith.constant 0 : index
    %c0_10 = arith.constant 0 : index
    %10 = vector.load %arg5[%c0_9, %c0_10] : memref<4x1xf32, #tpu.memory_space<vmem>>, vector<4x1xf32>
    %11 = vector.broadcast %10 : vector<4x1xf32> to vector<4x16xf32>
    %12 = arith.addf %9, %11 : vector<4x16xf32>
    %c0_11 = arith.constant 0 : index
    %c0_12 = arith.constant 0 : index
    %13 = vector.load %arg6[%c0_11, %c0_12] : memref<4x16xf32, #tpu.memory_space<vmem>>, vector<4x16xf32>
    tpu.vector_store %arg6[%c0_11, %c0_12], %12 {strides = array<i32>} : memref<4x16xf32, #tpu.memory_space<vmem>>, vector<4x16xf32>,
    return
  }
  func.func @transform_0(%arg0: i32) -> (i32, i32) {
    %c0_i32 = arith.constant 0 : i32
    %c0_i32_0 = arith.constant 0 : i32
    return %arg0, %c0_i32 : i32, i32
  }
  func.func @transform_1(%arg0: i32) -> (i32, i32) {
    %c0_i32 = arith.constant 0 : i32
    %c0_i32_0 = arith.constant 0 : i32
    %c0_i32_1 = arith.constant 0 : i32
    return %c0_i32, %c0_i32_0 : i32, i32
  }
  func.func @transform_2(%arg0: i32) -> (i32, i32) {
    %c0_i32 = arith.constant 0 : i32
    %c0_i32_0 = arith.constant 0 : i32
    %c0_i32_1 = arith.constant 0 : i32
    return %c0_i32, %c0_i32_0 : i32, i32
  }
  func.func @transform_3(%arg0: i32) -> (i32, i32) {
    %c0_i32 = arith.constant 0 : i32
    %c0_i32_0 = arith.constant 0 : i32
    %c0_i32_1 = arith.constant 0 : i32
    return %c0_i32, %c0_i32_0 : i32, i32
  }
  func.func @transform_4(%arg0: i32) -> (i32, i32) {
    %c0_i32 = arith.constant 0 : i32
    %c0_i32_0 = arith.constant 0 : i32
    %c0_i32_1 = arith.constant 0 : i32
    return %c0_i32, %c0_i32_0 : i32, i32
  }
  func.func @transform_5(%arg0: i32) -> (i32, i32) {
    %c0_i32 = arith.constant 0 : i32
    %c0_i32_0 = arith.constant 0 : i32
    return %c0_i32, %arg0 : i32, i32
  }
}

</mosaic_0001>

<bundles_post_ra>
// kernel: eoe_forward.1
= control target key start
LH: loop header
LB: loop body
LE: loop exit
PB: predicated region body
PF: predicated region fallthrough
CT: control target
= control target key end

     0   :  { %10 = vsyncpa [#allocation3], 0  ;;  %s242_s0 = inlined_call_operand.hbm [shape: f32[16,16], index: 0, kind: input, shape index: {}]   ;;  %s243_s1 = inlined_call_operand.vmem [shape: f32[8,16], index: 1, kind: input, shape index: {}]   ;;  %s244_s2 = inlined_call_operand.vmem [shape: f32[8,1], index: 2, kind: input, shape index: {}]   ;;  %s245_s3 = inlined_call_operand.vmem [shape: f32[4,8], index: 3, kind: input, shape index: {}]   ;;  %s246_s4 = inlined_call_operand.vmem [shape: f32[4,1], index: 4, kind: input, shape index: {}]   ;;  %s247_s5 = inlined_call_operand.hbm [shape: f32[4,16], index: 5, kind: output, shape index: {}]  }
   0x1   :  { %11 = vsyncpa [#allocation4], 0  ;;  %s16_s20 = sshll.u32 %s242_s0, 4  ;;  %s189_s21 = smov [#allocation2]   ;;  %s17_s20 = int_to_ptr.hbm [resolvable:$true] %s16_s20 }
   0x2   :  { %s18_s22 = sshll.u32 %s189_s21, 4  ;;  %s190_s23 = smov 128   ;;  %s19_s22 = int_to_ptr.vmem [resolvable:$true] %s18_s22 }
   0x3   :  { %s191_s24 = smov 8  }
   0x4   :  { %24 = dma.hbm_to_vmem [thread:$0]  %s17_s20, 256, %s19_s22, [#allocation3], %s190_s23, %s190_s23, %s191_s24  }
   0x5   :  { %185 = dma.done.wait [#allocation3], 256  }
   0x6   :  { %186 = vsyncadd [#allocation3], 4294967040  ;;  %v192_v0 = vmov 0   ;;  %vm46_vm0 = vcmask 130048   ;;  %v39_v1 = vld [vmem:[#allocation2 + $0x8] sm:$0xff]  ;;  %v40_v2 = vld [vmem:[%s244_s2] sm:$0xff] }
   0x7   :  { %136 = vset.pattern.permute.xlu0 %v192_v0  ;;  %127 = vmatpush.xpose.msk.msra.mxu0 %vm46_vm0, %v39_v1  ;;  %v38_v3 = vld [vmem:[#allocation2] sm:$0xff]  ;;  %vm84_vm1 = vcmask 64512   ;;  %s193_s2 = smov [#allocation5]   ;;  %s117_s9 = sshll.u32 %s247_s5, 4  ;;  %vm108_vm2 = vcmask 125952   ;;  %s118_s9 = int_to_ptr.hbm [resolvable:$true] %s117_s9 }
   0x8   :  { %43 = vperm.xlu0 %136, %v40_v2   ;;  %v37_v4 = vld [vmem:[%s243_s1] sm:$0xff]  ;;  %s115_s7 = sshll.u32 %s193_s2, 4  ;;  %s116_s7 = int_to_ptr.vmem [resolvable:$true] %s115_s7 }
   0x9   :  { %v78_v5 = vld [vmem:[%s246_s4] sm:$0xf] }
   0xa   :  { %v77_v10 = vld [vmem:[%s245_s3] sm:$0xf] }
   0xb   :  { %128 = vmatpush.xpose.msk.msra.mxu0 %vm46_vm0, %v38_v3 }
   0xe   :  { %129 = vmatmul.msk.f32.vlgmr.msra.gmra.mxu0 %vm46_vm0, %v37_v4 }
  0x10   :  { %81 = vperm.xlu0 %136, %v78_v5  }
  0x7a   :  { %v44_v6 = vpop.permute.xlu0 %43 }
  0x82   :  { %v82_v11 = vpop.permute.xlu0 %81 }
  0x8b   :  { %v73_v7 = vpop.f32.mrf.mxu0 }
  0x8c   :  { %v74_v8 = vadd.f32 %v73_v7, %v44_v6 }
  0x8e   :  { %v76_v9 = vmax.f32 %v74_v8, 0.0 }
  0x90   :  { %103 = vmatpush.msra.mxu1 %v76_v9 }
  0x91   :  { %130 = vmatmul.msk.f32.vlgmr.msra.gmra.mxu1 %vm84_vm1, %v77_v10 }
 0x10e   :  { %v105_v12 = vpop.f32.mrf.mxu1 }
 0x10f   :  { %v106_v13 = vadd.f32 %v105_v12, %v82_v11 }
 0x111   :  { %109 = vst.msk [vmem:[#allocation5] sm:$0xf] %vm108_vm2, %v106_v13 }
 0x112   :  { %120 = dma.vmem_to_hbm [thread:$0]  %s116_s7, 64, %s118_s9, [#allocation4]  }
 0x113   :  { %187 = dma.done.wait [#allocation4], 64  }
 0x114   :  { %188 = vsyncadd [#allocation4], 4294967232 }
 0x115   :  { %125 = vsyncpa [#allocation3], 1 }
 0x116   :  { %126 = vsyncpa [#allocation4], 1 }

</bundles_post_ra>
